<compile_context>
chip_gen: v6e
topology: v6e:2x2x1
jax: 0.10.0
libtpu: 0.0.40
codegen_flags: <defaults>
</compile_context>

<pallas_src>
import jax
import jax.numpy as jnp
from jax.experimental import pallas as pl
from jax.experimental.pallas import tpu as pltpu

# Logical layer dims from the PyTorch module.
DIMS = [283, 512, 256, 128, 64, 32, 3]
# Storage dims per layer (input, output) after padding:
#   - layer-1 contraction stays at 283 (no HBM pad round trip),
#   - narrow hidden widths 64/32 padded to 128 (weights resident, VMEM-only),
#   - final output padded to 8 columns only (lane-masked 32 B/row store).
IN_PDIMS = [283, 512, 256, 128, 128, 128]
OUT_PDIMS = [512, 256, 128, 128, 128, 8]
BN_EPS = 1e-5
TM_CAP = 512  # batch-tile cap; sweepable, VMEM stays well under limits


def _round_up(x, m):
    return (x + m - 1) // m * m


def mlp_kernel(x_ref,
               w1_ref, b1_ref, w2_ref, b2_ref, w3_ref, b3_ref,
               w4_ref, b4_ref, w5_ref, b5_ref, w6_ref, b6_ref,
               o_ref):
    """Fused MLP on one (TM, 283) batch tile. ReLU after layers 1-5 (BN folded)."""
    h = x_ref[...].astype(jnp.bfloat16)
    ws = (w1_ref, w2_ref, w3_ref, w4_ref, w5_ref)
    bs = (b1_ref, b2_ref, b3_ref, b4_ref, b5_ref)
    for w_ref, b_ref in zip(ws, bs):
        a = jnp.dot(h, w_ref[...], preferred_element_type=jnp.float32) + b_ref[...]
        h = jnp.maximum(a, 0.0).astype(jnp.bfloat16)
    o_ref[...] = (jnp.dot(h, w6_ref[...], preferred_element_type=jnp.float32)
                  + b6_ref[...])


def init_params(key):
    """Parameters mirroring the PyTorch module (fresh init, eval-mode BN stats).

    Linear weights ~ U(-1/sqrt(fan_in), 1/sqrt(fan_in)), stored as (in, out).
    """
    params = []
    for i in range(6):
        fan_in, fan_out = DIMS[i], DIMS[i + 1]
        key, kw, kb = jax.random.split(key, 3)
        bound = 1.0 / jnp.sqrt(jnp.float32(fan_in))
        w = jax.random.uniform(kw, (fan_in, fan_out), jnp.float32, -bound, bound)
        b = jax.random.uniform(kb, (fan_out,), jnp.float32, -bound, bound)
        layer = {"w": w, "b": b}
        if i < 5:  # layers 1..5 are followed by BatchNorm1d
            layer["bn_gamma"] = jnp.ones((fan_out,), jnp.float32)
            layer["bn_beta"] = jnp.zeros((fan_out,), jnp.float32)
            layer["bn_mean"] = jnp.zeros((fan_out,), jnp.float32)
            layer["bn_var"] = jnp.ones((fan_out,), jnp.float32)
        params.append(layer)
    return params


def prepare_params(params):
    """One-time prep: fold eval-mode BN into the Linear, zero-pad to the storage
    dims above, cast weights to bf16. Padded rows/cols are zero, so padded lanes
    stay zero through every layer."""
    prepared = []
    for i, layer in enumerate(params):
        w, b = layer["w"], layer["b"]
        if i < 5:
            scale = layer["bn_gamma"] / jnp.sqrt(layer["bn_var"] + BN_EPS)
            w = w * scale[None, :]
            b = (b - layer["bn_mean"]) * scale + layer["bn_beta"]
        k_pad, n_pad = IN_PDIMS[i], OUT_PDIMS[i]
        w = jnp.pad(w, ((0, k_pad - w.shape[0]), (0, n_pad - w.shape[1])))
        b = jnp.pad(b, (0, n_pad - b.shape[0]))
        prepared.append((w.astype(jnp.bfloat16),
                         b.reshape(1, -1).astype(jnp.float32)))
    return prepared


@jax.jit
def neural_network_forward(x, prepared):
    B, K = x.shape
    assert K == DIMS[0]
    N_out = OUT_PDIMS[-1]

    # Adaptive batch tile: large (up to TM_CAP) to amortize per-step overhead
    # and fill the MXU, balanced so the trailing partial block is never mostly
    # padding, and >= 2 grid blocks whenever B >= 16 so both v7x TensorCores
    # get work via dimension_semantics=("parallel",).
    n_blocks = pl.cdiv(B, TM_CAP)
    if B >= 16:
        n_blocks = max(n_blocks, 2)
    TM = _round_up(pl.cdiv(B, n_blocks), 8)
    grid = pl.cdiv(B, TM)

    flat_args = [x]
    in_specs = [pl.BlockSpec((TM, K), lambda i: (i, 0))]
    for w, b in prepared:
        flat_args += [w, b]
        # Full-shape blocks with constant index_map -> fetched once, resident
        # in VMEM for every grid step.
        in_specs += [pl.BlockSpec(w.shape, lambda i: (0, 0)),
                     pl.BlockSpec(b.shape, lambda i: (0, 0))]

    flops = 2 * B * sum(IN_PDIMS[i] * OUT_PDIMS[i] for i in range(6))
    bytes_accessed = (sum(w.size * 2 + b.size * 4 for w, b in prepared)
                      + B * K * 4 + B * N_out * 4)

    out = pl.pallas_call(
        mlp_kernel,
        out_shape=jax.ShapeDtypeStruct((B, N_out), jnp.float32),
        grid=(grid,),
        in_specs=in_specs,
        out_specs=pl.BlockSpec((TM, N_out), lambda i: (i, 0)),
        compiler_params=pltpu.CompilerParams(
            dimension_semantics=("parallel",)),  # shards batch blocks on v7x's 2 TCs
        cost_estimate=pl.CostEstimate(
            flops=flops, transcendentals=0, bytes_accessed=bytes_accessed),
    )(*flat_args)

    return out[:, :DIMS[-1]]


def reference_forward(x, params, matmul_dtype=jnp.float32):
    """Pure-JAX reference (eval-mode BN folded), optionally with bf16 matmuls."""
    h = x
    for i, layer in enumerate(params):
        w, b = layer["w"], layer["b"]
        if i < 5:
            scale = layer["bn_gamma"] / jnp.sqrt(layer["bn_var"] + BN_EPS)
            w = w * scale[None, :]
            b = (b - layer["bn_mean"]) * scale + layer["bn_beta"]
        h = jnp.dot(h.astype(matmul_dtype), w.astype(matmul_dtype),
                    preferred_element_type=jnp.float32) + b
        if i < 5:
            h = jnp.maximum(h, 0.0)
    return h


if __name__ == "__main__":
    key = jax.random.PRNGKey(0)
    key, kx = jax.random.split(key)
    B = 8
    x = jax.random.normal(kx, (B, DIMS[0]), jnp.float32)

    params = init_params(key)
    prepared = prepare_params(params)   # fold + pad + bf16 cast, once

    out = jax.block_until_ready(neural_network_forward(x, prepared))
    assert out.shape == (B, 3), out.shape

    # Match against a reference that applies the same bf16-input / f32-accum
    # matmul policy (tight tolerance), plus a loose sanity check vs full f32.
    ref_bf16 = reference_forward(x, params, matmul_dtype=jnp.bfloat16)
    ref_f32 = reference_forward(x, params, matmul_dtype=jnp.float32)
    assert jnp.allclose(out, ref_bf16, atol=2e-3, rtol=2e-3), "mismatch vs bf16 reference"
    assert jnp.allclose(out, ref_f32, atol=5e-2, rtol=5e-2), "mismatch vs f32 reference"

    print("KERNEL_OK")
</pallas_src>

<mosaic_0001>
module attributes {stable_mosaic.version = 11 : i64} {
  func.func @mlp_kernel(%arg0: i32, %arg1: memref<8x283xf32, #tpu.memory_space<vmem>>, %arg2: memref<283x512xbf16, #tpu.memory_space<vmem>>, %arg3: memref<1x512xf32, #tpu.memory_space<vmem>>, %arg4: memref<512x256xbf16, #tpu.memory_space<vmem>>, %arg5: memref<1x256xf32, #tpu.memory_space<vmem>>, %arg6: memref<256x128xbf16, #tpu.memory_space<vmem>>, %arg7: memref<1x128xf32, #tpu.memory_space<vmem>>, %arg8: memref<128x128xbf16, #tpu.memory_space<vmem>>, %arg9: memref<1x128xf32, #tpu.memory_space<vmem>>, %arg10: memref<128x128xbf16, #tpu.memory_space<vmem>>, %arg11: memref<1x128xf32, #tpu.memory_space<vmem>>, %arg12: memref<128x8xbf16, #tpu.memory_space<vmem>>, %arg13: memref<1x8xf32, #tpu.memory_space<vmem>>, %arg14: memref<8x8xf32, #tpu.memory_space<vmem>>) attributes {dimension_semantics = [#tpu.dimension_semantics<parallel>], iteration_bounds = array<i64: 1>, scalar_prefetch = 0 : i64, scratch_operands = 0 : i64, tpu.core_type = #tpu.core_type<tc>, window_params = [{transform_indices = @transform_0, window_bounds = array<i64: 8, 283>}, {pipeline_mode = #tpu.pipeline_mode<synchronous>, transform_indices = @transform_1, window_bounds = array<i64: 283, 512>}, {pipeline_mode = #tpu.pipeline_mode<synchronous>, transform_indices = @transform_2, window_bounds = array<i64: 1, 512>}, {pipeline_mode = #tpu.pipeline_mode<synchronous>, transform_indices = @transform_3, window_bounds = array<i64: 512, 256>}, {pipeline_mode = #tpu.pipeline_mode<synchronous>, transform_indices = @transform_4, window_bounds = array<i64: 1, 256>}, {pipeline_mode = #tpu.pipeline_mode<synchronous>, transform_indices = @transform_5, window_bounds = array<i64: 256, 128>}, {pipeline_mode = #tpu.pipeline_mode<synchronous>, transform_indices = @transform_6, window_bounds = array<i64: 1, 128>}, {pipeline_mode = #tpu.pipeline_mode<synchronous>, transform_indices = @transform_7, window_bounds = array<i64: 128, 128>}, {pipeline_mode = #tpu.pipeline_mode<synchronous>, transform_indices = @transform_8, window_bounds = array<i64: 1, 128>}, {pipeline_mode = #tpu.pipeline_mode<synchronous>, transform_indices = @transform_9, window_bounds = array<i64: 128, 128>}, {pipeline_mode = #tpu.pipeline_mode<synchronous>, transform_indices = @transform_10, window_bounds = array<i64: 1, 128>}, {pipeline_mode = #tpu.pipeline_mode<synchronous>, transform_indices = @transform_11, window_bounds = array<i64: 128, 8>}, {pipeline_mode = #tpu.pipeline_mode<synchronous>, transform_indices = @transform_12, window_bounds = array<i64: 1, 8>}, {transform_indices = @transform_13, window_bounds = array<i64: 8, 8>}]} {
    %c0 = arith.constant 0 : index
    %c0_0 = arith.constant 0 : index
    %0 = vector.load %arg1[%c0, %c0_0] : memref<8x283xf32, #tpu.memory_space<vmem>>, vector<8x283xf32>
    %1 = arith.truncf %0 : vector<8x283xf32> to vector<8x283xbf16>
    %c0_1 = arith.constant 0 : index
    %c0_2 = arith.constant 0 : index
    %2 = vector.load %arg2[%c0_1, %c0_2] : memref<283x512xbf16, #tpu.memory_space<vmem>>, vector<283x512xbf16>
    %cst = arith.constant dense<0.000000e+00> : vector<8x512xf32>
    %3 = tpu.matmul %1, %2, %cst {dimension_numbers = #tpu.dot_dimension_numbers<[1], [0], [0], [1], [0, 0, 1, 1], [], []>} : vector<8x283xbf16>, vector<283x512xbf16>, vector<8x512xf32> -> vector<8x512xf32>
    %c0_3 = arith.constant 0 : index
    %c0_4 = arith.constant 0 : index
    %4 = vector.load %arg3[%c0_3, %c0_4] : memref<1x512xf32, #tpu.memory_space<vmem>>, vector<1x512xf32>
    %5 = vector.broadcast %4 : vector<1x512xf32> to vector<8x512xf32>
    %6 = arith.addf %3, %5 : vector<8x512xf32>
    %cst_5 = arith.constant 0.000000e+00 : f32
    %7 = vector.broadcast %cst_5 : f32 to vector<8x512xf32>
    %8 = arith.maximumf %6, %7 : vector<8x512xf32>
    %9 = arith.truncf %8 : vector<8x512xf32> to vector<8x512xbf16>
    %c0_6 = arith.constant 0 : index
    %c0_7 = arith.constant 0 : index
    %10 = vector.load %arg4[%c0_6, %c0_7] : memref<512x256xbf16, #tpu.memory_space<vmem>>, vector<512x256xbf16>
    %cst_8 = arith.constant dense<0.000000e+00> : vector<8x256xf32>
    %11 = tpu.matmul %9, %10, %cst_8 {dimension_numbers = #tpu.dot_dimension_numbers<[1], [0], [0], [1], [0, 0, 1, 1], [], []>} : vector<8x512xbf16>, vector<512x256xbf16>, vector<8x256xf32> -> vector<8x256xf32>
    %c0_9 = arith.constant 0 : index
    %c0_10 = arith.constant 0 : index
    %12 = vector.load %arg5[%c0_9, %c0_10] : memref<1x256xf32, #tpu.memory_space<vmem>>, vector<1x256xf32>
    %13 = vector.broadcast %12 : vector<1x256xf32> to vector<8x256xf32>
    %14 = arith.addf %11, %13 : vector<8x256xf32>
    %cst_11 = arith.constant 0.000000e+00 : f32
    %15 = vector.broadcast %cst_11 : f32 to vector<8x256xf32>
    %16 = arith.maximumf %14, %15 : vector<8x256xf32>
    %17 = arith.truncf %16 : vector<8x256xf32> to vector<8x256xbf16>
    %c0_12 = arith.constant 0 : index
    %c0_13 = arith.constant 0 : index
    %18 = vector.load %arg6[%c0_12, %c0_13] : memref<256x128xbf16, #tpu.memory_space<vmem>>, vector<256x128xbf16>
    %cst_14 = arith.constant dense<0.000000e+00> : vector<8x128xf32>
    %19 = tpu.matmul %17, %18, %cst_14 {dimension_numbers = #tpu.dot_dimension_numbers<[1], [0], [0], [1], [0, 0, 1, 1], [], []>} : vector<8x256xbf16>, vector<256x128xbf16>, vector<8x128xf32> -> vector<8x128xf32>
    %c0_15 = arith.constant 0 : index
    %c0_16 = arith.constant 0 : index
    %20 = vector.load %arg7[%c0_15, %c0_16] : memref<1x128xf32, #tpu.memory_space<vmem>>, vector<1x128xf32>
    %21 = vector.broadcast %20 : vector<1x128xf32> to vector<8x128xf32>
    %22 = arith.addf %19, %21 : vector<8x128xf32>
    %cst_17 = arith.constant 0.000000e+00 : f32
    %23 = vector.broadcast %cst_17 : f32 to vector<8x128xf32>
    %24 = arith.maximumf %22, %23 : vector<8x128xf32>
    %25 = arith.truncf %24 : vector<8x128xf32> to vector<8x128xbf16>
    %c0_18 = arith.constant 0 : index
    %c0_19 = arith.constant 0 : index
    %26 = vector.load %arg8[%c0_18, %c0_19] : memref<128x128xbf16, #tpu.memory_space<vmem>>, vector<128x128xbf16>
    %cst_20 = arith.constant dense<0.000000e+00> : vector<8x128xf32>
    %27 = tpu.matmul %25, %26, %cst_20 {dimension_numbers = #tpu.dot_dimension_numbers<[1], [0], [0], [1], [0, 0, 1, 1], [], []>} : vector<8x128xbf16>, vector<128x128xbf16>, vector<8x128xf32> -> vector<8x128xf32>
    %c0_21 = arith.constant 0 : index
    %c0_22 = arith.constant 0 : index
    %28 = vector.load %arg9[%c0_21, %c0_22] : memref<1x128xf32, #tpu.memory_space<vmem>>, vector<1x128xf32>
    %29 = vector.broadcast %28 : vector<1x128xf32> to vector<8x128xf32>
    %30 = arith.addf %27, %29 : vector<8x128xf32>
    %cst_23 = arith.constant 0.000000e+00 : f32
    %31 = vector.broadcast %cst_23 : f32 to vector<8x128xf32>
    %32 = arith.maximumf %30, %31 : vector<8x128xf32>
    %33 = arith.truncf %32 : vector<8x128xf32> to vector<8x128xbf16>
    %c0_24 = arith.constant 0 : index
    %c0_25 = arith.constant 0 : index
    %34 = vector.load %arg10[%c0_24, %c0_25] : memref<128x128xbf16, #tpu.memory_space<vmem>>, vector<128x128xbf16>
    %cst_26 = arith.constant dense<0.000000e+00> : vector<8x128xf32>
    %35 = tpu.matmul %33, %34, %cst_26 {dimension_numbers = #tpu.dot_dimension_numbers<[1], [0], [0], [1], [0, 0, 1, 1], [], []>} : vector<8x128xbf16>, vector<128x128xbf16>, vector<8x128xf32> -> vector<8x128xf32>
    %c0_27 = arith.constant 0 : index
    %c0_28 = arith.constant 0 : index
    %36 = vector.load %arg11[%c0_27, %c0_28] : memref<1x128xf32, #tpu.memory_space<vmem>>, vector<1x128xf32>
    %37 = vector.broadcast %36 : vector<1x128xf32> to vector<8x128xf32>
    %38 = arith.addf %35, %37 : vector<8x128xf32>
    %cst_29 = arith.constant 0.000000e+00 : f32
    %39 = vector.broadcast %cst_29 : f32 to vector<8x128xf32>
    %40 = arith.maximumf %38, %39 : vector<8x128xf32>
    %41 = arith.truncf %40 : vector<8x128xf32> to vector<8x128xbf16>
    %c0_30 = arith.constant 0 : index
    %c0_31 = arith.constant 0 : index
    %42 = vector.load %arg12[%c0_30, %c0_31] : memref<128x8xbf16, #tpu.memory_space<vmem>>, vector<128x8xbf16>
    %cst_32 = arith.constant dense<0.000000e+00> : vector<8x8xf32>
    %43 = tpu.matmul %41, %42, %cst_32 {dimension_numbers = #tpu.dot_dimension_numbers<[1], [0], [0], [1], [0, 0, 1, 1], [], []>} : vector<8x128xbf16>, vector<128x8xbf16>, vector<8x8xf32> -> vector<8x8xf32>
    %c0_33 = arith.constant 0 : index
    %c0_34 = arith.constant 0 : index
    %44 = vector.load %arg13[%c0_33, %c0_34] : memref<1x8xf32, #tpu.memory_space<vmem>>, vector<1x8xf32>
    %45 = vector.broadcast %44 : vector<1x8xf32> to vector<8x8xf32>
    %46 = arith.addf %43, %45 : vector<8x8xf32>
    %c0_35 = arith.constant 0 : index
    %c0_36 = arith.constant 0 : index
    %47 = vector.load %arg14[%c0_35, %c0_36] : memref<8x8xf32, #tpu.memory_space<vmem>>, vector<8x8xf32>
    tpu.vector_store %arg14[%c0_35, %c0_36], %46 {strides = array<i32>} : memref<8x8xf32, #tpu.memory_space<vmem>>, vector<8x8xf32>,
    return
  }
  func.func @transform_0(%arg0: i32) -> (i32, i32) {
    %c0_i32 = arith.constant 0 : i32
    %c0_i32_0 = arith.constant 0 : i32
    return %arg0, %c0_i32 : i32, i32
  }
  func.func @transform_1(%arg0: i32) -> (i32, i32) {
    %c0_i32 = arith.constant 0 : i32
    %c0_i32_0 = arith.constant 0 : i32
    %c0_i32_1 = arith.constant 0 : i32
    return %c0_i32, %c0_i32_0 : i32, i32
  }
  func.func @transform_2(%arg0: i32) -> (i32, i32) {
    %c0_i32 = arith.constant 0 : i32
    %c0_i32_0 = arith.constant 0 : i32
    %c0_i32_1 = arith.constant 0 : i32
    return %c0_i32, %c0_i32_0 : i32, i32
  }
  func.func @transform_3(%arg0: i32) -> (i32, i32) {
    %c0_i32 = arith.constant 0 : i32
    %c0_i32_0 = arith.constant 0 : i32
    %c0_i32_1 = arith.constant 0 : i32
    return %c0_i32, %c0_i32_0 : i32, i32
  }
  func.func @transform_4(%arg0: i32) -> (i32, i32) {
    %c0_i32 = arith.constant 0 : i32
    %c0_i32_0 = arith.constant 0 : i32
    %c0_i32_1 = arith.constant 0 : i32
    return %c0_i32, %c0_i32_0 : i32, i32
  }
  func.func @transform_5(%arg0: i32) -> (i32, i32) {
    %c0_i32 = arith.constant 0 : i32
    %c0_i32_0 = arith.constant 0 : i32
    %c0_i32_1 = arith.constant 0 : i32
    return %c0_i32, %c0_i32_0 : i32, i32
  }
  func.func @transform_6(%arg0: i32) -> (i32, i32) {
    %c0_i32 = arith.constant 0 : i32
    %c0_i32_0 = arith.constant 0 : i32
    %c0_i32_1 = arith.constant 0 : i32
    return %c0_i32, %c0_i32_0 : i32, i32
  }
  func.func @transform_7(%arg0: i32) -> (i32, i32) {
    %c0_i32 = arith.constant 0 : i32
    %c0_i32_0 = arith.constant 0 : i32
    %c0_i32_1 = arith.constant 0 : i32
    return %c0_i32, %c0_i32_0 : i32, i32
  }
  func.func @transform_8(%arg0: i32) -> (i32, i32) {
    %c0_i32 = arith.constant 0 : i32
    %c0_i32_0 = arith.constant 0 : i32
    %c0_i32_1 = arith.constant 0 : i32
    return %c0_i32, %c0_i32_0 : i32, i32
  }
  func.func @transform_9(%arg0: i32) -> (i32, i32) {
    %c0_i32 = arith.constant 0 : i32
    %c0_i32_0 = arith.constant 0 : i32
    %c0_i32_1 = arith.constant 0 : i32
    return %c0_i32, %c0_i32_0 : i32, i32
  }
  func.func @transform_10(%arg0: i32) -> (i32, i32) {
    %c0_i32 = arith.constant 0 : i32
    %c0_i32_0 = arith.constant 0 : i32
    %c0_i32_1 = arith.constant 0 : i32
    return %c0_i32, %c0_i32_0 : i32, i32
  }
  func.func @transform_11(%arg0: i32) -> (i32, i32) {
    %c0_i32 = arith.constant 0 : i32
    %c0_i32_0 = arith.constant 0 : i32
    %c0_i32_1 = arith.constant 0 : i32
    return %c0_i32, %c0_i32_0 : i32, i32
  }
  func.func @transform_12(%arg0: i32) -> (i32, i32) {
    %c0_i32 = arith.constant 0 : i32
    %c0_i32_0 = arith.constant 0 : i32
    %c0_i32_1 = arith.constant 0 : i32
    return %c0_i32, %c0_i32_0 : i32, i32
  }
  func.func @transform_13(%arg0: i32) -> (i32, i32) {
    %c0_i32 = arith.constant 0 : i32
    %c0_i32_0 = arith.constant 0 : i32
    return %arg0, %c0_i32 : i32, i32
  }
}

</mosaic_0001>

<bundles_post_ra>
// kernel: neural_network_forward.1
= control target key start
LH: loop header
LB: loop body
LE: loop exit
PB: predicated region body
PF: predicated region fallthrough
CT: control target
= control target key end

     0   :  { %18 = vsyncpa [#allocation3], 0  ;;  %s2653_s0 = inlined_call_operand.hbm [shape: f32[8,283], index: 0, kind: input, shape index: {}]   ;;  %s2654_s1 = inlined_call_operand.hbm [shape: bf16[283,512], index: 1, kind: input, shape index: {}]   ;;  %s2655_s2 = inlined_call_operand.vmem [shape: f32[1,512], index: 2, kind: input, shape index: {}]   ;;  %s2656_s3 = inlined_call_operand.hbm [shape: bf16[512,256], index: 3, kind: input, shape index: {}]   ;;  %s2657_s4 = inlined_call_operand.vmem [shape: f32[1,256], index: 4, kind: input, shape index: {}]   ;;  %s2658_s5 = inlined_call_operand.hbm [shape: bf16[256,128], index: 5, kind: input, shape index: {}]   ;;  %s2659_s6 = inlined_call_operand.vmem [shape: f32[1,128], index: 6, kind: input, shape index: {}]   ;;  %s2660_s7 = inlined_call_operand.vmem [shape: bf16[128,128], index: 7, kind: input, shape index: {}]   ;;  %s2661_s8 = inlined_call_operand.vmem [shape: f32[1,128], index: 8, kind: input, shape index: {}]   ;;  %s2662_s9 = inlined_call_operand.hbm [shape: bf16[128,128], index: 9, kind: input, shape index: {}]   ;;  %s2663_s10 = inlined_call_operand.vmem [shape: f32[1,128], index: 10, kind: input, shape index: {}]   ;;  %s2664_s11 = inlined_call_operand.vmem [shape: bf16[128,8], index: 11, kind: input, shape index: {}]   ;;  %s2665_s12 = inlined_call_operand.vmem [shape: f32[1,8], index: 12, kind: input, shape index: {}]   ;;  %s2666_s13 = inlined_call_operand.vmem [shape: f32[8,8], index: 13, kind: output, shape index: {}]  }
   0x1   :  { %19 = vsyncpa [#allocation5], 0 }
   0x2   :  { %20 = vsyncpa [#allocation8], 0  ;;  %s2420_s25 = smov [#allocation4]  }
   0x3   :  { %s36_s26 = sshll.u32 %s2420_s25, 4  ;;  %s37_s26 = int_to_ptr.vmem [resolvable:$true] %s36_s26 }
   0x4   :  { %s2322_s27 = scalar_lea.vmem %s37_s26, 9216  ;;  %p2327_p1 = scmp.lt.s32.totalorder %s37_s26, %s37_s26 }
   0x5   :  { %p2323_p0 = scmp.ne.s32.totalorder %s37_s26, %s2322_s27  ;;  %p2328_p2 = scmp.lt.s32.totalorder %s2322_s27, %s2322_s27 }
   0x7   :  { %p2329_p3 = por %p2328_p2, %p2327_p1 }
   0x9   :  { %p2330_p4 = pnand %p2329_p3, %p2323_p0 }
   0xb   :  { %2333 = shalt.err (!%p2330_p4)
}
   0xc   :  { %s2421_s28 = smov 256   ;;  %s2422_s29 = smov 16  }
   0xd   :  { %42 = dma.hbm_to_vmem [thread:$0]  %s2654_s1, 9216, %s37_s26, [#allocation5], %s2421_s28, %s2421_s28, %s2422_s29  }
   0xe   :  { %s2423_s15 = smov [#allocation7]  }
   0xf   :  { %s64_s16 = sshll.u32 %s2423_s15, 4  ;;  %s65_s16 = int_to_ptr.vmem [resolvable:$true] %s64_s16 }
  0x10   :  { %s2342_s17 = scalar_lea.vmem %s65_s16, 2048  ;;  %p2347_p6 = scmp.lt.s32.totalorder %s65_s16, %s65_s16 }
  0x11   :  { %p2343_p5 = scmp.ne.s32.totalorder %s65_s16, %s2342_s17  ;;  %p2348_p7 = scmp.lt.s32.totalorder %s2342_s17, %s2342_s17 }
  0x13   :  { %p2349_p8 = por %p2348_p7, %p2347_p6 }
  0x15   :  { %p2350_p9 = pnand %p2349_p8, %p2343_p5 }
  0x17   :  { %2353 = shalt.err (!%p2350_p9)
}
  0x18   :  { %s2424_s18 = smov 64   ;;  %s2425_s19 = smov 4  }
  0x19   :  { %70 = dma.hbm_to_vmem [thread:$0]  %s2658_s5, 2048, %s65_s16, [#allocation8], %s2424_s18, %s2424_s18, %s2425_s19  }
  0x1a   :  { %s2426_s1 = smov [#allocation2]   ;;  %s2427_s23 = smov [#allocation6]  }
  0x1b   :  { %s27_s22 = sshll.u32 %s2426_s1, 4  ;;  %s50_s24 = sshll.u32 %s2427_s23, 4  ;;  %s28_s22 = int_to_ptr.vmem [resolvable:$true] %s27_s22  ;;  %s51_s24 = int_to_ptr.vmem [resolvable:$true] %s50_s24 }
  0x1c   :  { %s2362_s25 = scalar_lea.vmem %s28_s22, 384  ;;  %p2367_p11 = scmp.lt.s32.totalorder %s28_s22, %s28_s22 }
  0x1d   :  { %p2363_p10 = scmp.ne.s32.totalorder %s28_s22, %s2362_s25  ;;  %p2368_p12 = scmp.lt.s32.totalorder %s2362_s25, %s2362_s25 }
  0x1f   :  { %p2369_p13 = por %p2368_p12, %p2367_p11 }
  0x21   :  { %p2370_p0 = pnand %p2369_p13, %p2363_p10 }
  0x23   :  { %2373 = shalt.err (!%p2370_p0)
}
  0x24   :  { %30 = dma.hbm_to_vmem [thread:$0]  %s2653_s0, 384, %s28_s22, [#allocation3]  }
  0x25   :  { %s2382_s28 = scalar_lea.vmem %s51_s24, 8192  ;;  %p2387_p2 = scmp.lt.s32.totalorder %s51_s24, %s51_s24 }
  0x26   :  { %p2383_p1 = scmp.ne.s32.totalorder %s51_s24, %s2382_s28  ;;  %p2388_p3 = scmp.lt.s32.totalorder %s2382_s28, %s2382_s28 }
  0x28   :  { %p2389_p4 = por %p2388_p3, %p2387_p2 }
  0x2a   :  { %p2390_p5 = pnand %p2389_p4, %p2383_p1 }
  0x2c   :  { %2393 = shalt.err (!%p2390_p5)
}
  0x2d   :  { %s2428_s5 = smov 128   ;;  %s2429_s29 = smov 8  }
  0x2e   :  { %56 = dma.hbm_to_vmem [thread:$0]  %s2656_s3, 8192, %s51_s24, [#allocation5], %s2428_s5, %s2428_s5, %s2429_s29  }
  0x2f   :  { %s2430_s15 = smov [#allocation9]  }
  0x30   :  { %s82_s16 = sshll.u32 %s2430_s15, 4  ;;  %s83_s16 = int_to_ptr.vmem [resolvable:$true] %s82_s16 }
  0x31   :  { %s2402_s17 = scalar_lea.vmem %s83_s16, 1024  ;;  %p2407_p7 = scmp.lt.s32.totalorder %s83_s16, %s83_s16 }
  0x32   :  { %p2403_p6 = scmp.ne.s32.totalorder %s83_s16, %s2402_s17  ;;  %p2408_p8 = scmp.lt.s32.totalorder %s2402_s17, %s2402_s17 }
  0x34   :  { %p2409_p9 = por %p2408_p8, %p2407_p7 }
  0x36   :  { %p2410_p10 = pnand %p2409_p9, %p2403_p6 }
  0x38   :  { %2413 = shalt.err (!%p2410_p10)
}
  0x39   :  { %88 = dma.hbm_to_vmem [thread:$0]  %s2662_s9, 1024, %s83_s16, [#allocation8], %s2424_s18, %s2424_s18, %s2425_s19  }
  0x3a   :  { %2414 = dma.done.wait [#allocation3], 384  }
  0x3b   :  { %2415 = vsyncadd [#allocation3], 4294966912 }
  0x3c   :  { %2416 = dma.done.wait [#allocation5], 17408  }
  0x3d   :  { %2417 = vsyncadd [#allocation5], 4294949888 }
  0x3e   :  { %2418 = dma.done.wait [#allocation8], 3072  }
  0x3f   :  { %2419 = vsyncadd [#allocation8], 4294964224  ;;  %v2431_v0 = vmov 0   ;;  %vm571_vm0 = vcmask 1044480   ;;  %vm572_vm1 = vcmask 1045504   ;;  %v2432_v1 = vmov 65535  }
  0x40   :  { %660 = vmatprep.mubr.bf16.mxu1 %v2431_v0  ;;  %v573_v2 = vsel %vm571_vm0, 4294967295, %v2432_v1  ;;  %v2070_v3 = vld [vmem:[#allocation4 + $0xe4] ss:$16 sps:$4 sm:$0xff]   ;;  %v2072_v4 = vld [vmem:[#allocation4 + $0xe0] ss:$16 sps:$4 sm:$0xff]   ;;  %v113_v16 = vld [vmem:[#allocation2 + $0x10] sm:$0xff] }
  0x41   :  { %v2527_v5 = vsel %vm572_vm1, %v573_v2, 0  ;;  %587 = vmatprep.subr.bf16.mxu0 %v2070_v3  ;;  %v2073_v6 = vld [vmem:[#allocation4 + $0x224] ss:$16 sps:$4 sm:$0x3f]   ;;  %v2078_v11 = vld [vmem:[#allocation4 + $0xc0] ss:$16 sps:$4 sm:$0xff]   ;;  %v2531_v19 = vpack.c.bf16 %v113_v16, %v113_v16 }
  0x42   :  { %v2075_v7 = vld [vmem:[#allocation4 + $0x220] ss:$16 sps:$4 sm:$0x3f]   ;;  %588 = vmatpush1.bf16.msra.mxu0 %v2072_v4  ;;  %v2076_v8 = vld [vmem:[#allocation4 + $0xc4] ss:$16 sps:$4 sm:$0xff]   ;;  %v579_v9 = vand.u32 %v2073_v6, %v2527_v5  ;;  %vm567_vm2 = vcmask 220160  }
  0x43   :  { %v576_v10 = vand.u32 %v2075_v7, %v2527_v5  ;;  %589 = vmatprep.subr.bf16.mxu0 %v2076_v8  ;;  %v2079_v12 = vld [vmem:[#allocation4 + $0x204] ss:$16 sps:$4 sm:$0xff]   ;;  %v2081_v13 = vld [vmem:[#allocation4 + $0x200] ss:$16 sps:$4 sm:$0xff]   ;;  %v2087_v17 = vld [vmem:[#allocation4 + $0xec] ss:$16 sps:$4 sm:$0xff]  }
  0x44   :  { %640 = vmatprep.subr.bf16.mxu1 %v579_v9  ;;  %v2082_v14 = vld [vmem:[#allocation4 + $0xa4] ss:$16 sps:$4 sm:$0xff]   ;;  %v2084_v15 = vld [vmem:[#allocation4 + $0xa0] ss:$16 sps:$4 sm:$0xff]   ;;  %v2085_v20 = vld [vmem:[#allocation4 + $0xe8] ss:$16 sps:$4 sm:$0xff]  }
  0x45   :  { %641 = vmatpush1.bf16.msra.mxu1 %v576_v10  ;;  %v2088_v18 = vld [vmem:[#allocation4 + $0x84] ss:$16 sps:$4 sm:$0xff]   ;;  %v2090_v21 = vld [vmem:[#allocation4 + $0x80] ss:$16 sps:$4 sm:$0xff]   ;;  %v2093_v22 = vld [vmem:[#allocation4 + $0xcc] ss:$16 sps:$4 sm:$0xff]  }
  0x46   :  { %590 = vmatpush1.bf16.msra.mxu0 %v2078_v11  ;;  %642 = vmatprep.subr.bf16.mxu1 %v2079_v12  ;;  %v2094_v23 = vld [vmem:[#allocation4 + $0x64] ss:$16 sps:$4 sm:$0xff]   ;;  %v2091_v24 = vld [vmem:[#allocation4 + $0xc8] ss:$16 sps:$4 sm:$0xff]   ;;  %v2096_v25 = vld [vmem:[#allocation4 + $0x60] ss:$16 sps:$4 sm:$0xff]  }
  0x47   :  { %591 = vmatprep.subr.bf16.mxu0 %v2082_v14  ;;  %v2099_v26 = vld [vmem:[#allocation4 + $0xac] ss:$16 sps:$4 sm:$0xff]   ;;  %v2100_v27 = vld [vmem:[#allocation4 + $0x44] ss:$16 sps:$4 sm:$0xff]   ;;  %v2097_v28 = vld [vmem:[#allocation4 + $0xa8] ss:$16 sps:$4 sm:$0xff]  }
  0x48   :  { %v2102_v29 = vld [vmem:[#allocation4 + $0x40] ss:$16 sps:$4 sm:$0xff]   ;;  %v2105_v30 = vld [vmem:[#allocation4 + $0x8c] ss:$16 sps:$4 sm:$0xff]   ;;  %v2106_v31 = vld [vmem:[#allocation4 + $0x24] ss:$16 sps:$4 sm:$0xff]  }
  0x49   :  { %643 = vmatpush1.bf16.msra.mxu1 %v2081_v13  ;;  %v2103_v32 = vld [vmem:[#allocation4 + $0x88] ss:$16 sps:$4 sm:$0xff]   ;;  %v2108_v33 = vld [vmem:[#allocation4 + $0x20] ss:$16 sps:$4 sm:$0xff]   ;;  %v2111_v34 = vld [vmem:[#allocation4 + $0x6c] ss:$16 sps:$4 sm:$0xff]  }
  0x4a   :  { %592 = vmatpush1.bf16.msra.mxu0 %v2084_v15  ;;  %669 = vmatprep.subr.bf16.mxu1 %v2087_v17  ;;  %v2112_v35 = vld [vmem:[#allocation4 + $0x4] ss:$16 sps:$4 sm:$0xff]   ;;  %v2109_v36 = vld [vmem:[#allocation4 + $0x68] ss:$16 sps:$4 sm:$0xff]   ;;  %v2114_v37 = vld [vmem:[#allocation4] ss:$16 sps:$4 sm:$0xff]  }
  0x4b   :  { %593 = vmatprep.subr.bf16.mxu0 %v2088_v18  ;;  %v2117_v38 = vld [vmem:[#allocation4 + $0x4c] ss:$16 sps:$4 sm:$0xff]   ;;  %v2118_v39 = vld [vmem:[#allocation4 + $0x1e4] ss:$16 sps:$4 sm:$0xff]   ;;  %v2115_v40 = vld [vmem:[#allocation4 + $0x48] ss:$16 sps:$4 sm:$0xff]  }
  0x4c   :  { %1836 = vmatmul.mubr.msk.bf16.vlgmr.msra.gmra.mxu1 %vm567_vm2, %v2531_v19  ;;  %v2120_v41 = vld [vmem:[#allocation4 + $0x1e0] ss:$16 sps:$4 sm:$0xff]   ;;  %v2123_v42 = vld [vmem:[#allocation4 + $0x2c] ss:$16 sps:$4 sm:$0xff]   ;;  %v2124_v43 = vld [vmem:[#allocation4 + $0x1c4] ss:$16 sps:$4 sm:$0xff]  }
  0x4d   :  { %670 = vmatpush1.bf16.msra.mxu1 %v2085_v20  ;;  %v2121_v44 = vld [vmem:[#allocation4 + $0x28] ss:$16 sps:$4 sm:$0xff]   ;;  %v2126_v45 = vld [vmem:[#allocation4 + $0x1c0] ss:$16 sps:$4 sm:$0xff]   ;;  %v2129_v46 = vld [vmem:[#allocation4 + $0xc] ss:$16 sps:$4 sm:$0xff]  }
  0x4e   :  { %594 = vmatpush1.bf16.msra.mxu0 %v2090_v21  ;;  %671 = vmatprep.subr.bf16.mxu1 %v2093_v22  ;;  %v2130_v47 = vld [vmem:[#allocation4 + $0x1a4] ss:$16 sps:$4 sm:$0xff]   ;;  %v2127_v48 = vld [vmem:[#allocation4 + $0x8] ss:$16 sps:$4 sm:$0xff]   ;;  %v2132_v49 = vld [vmem:[#allocation4 + $0x1a0] ss:$16 sps:$4 sm:$0xff]  }
  0x4f   :  { %595 = vmatprep.subr.bf16.mxu0 %v2094_v23  ;;  %v2135_v50 = vld [vmem:[#allocation4 + $0x1ec] ss:$16 sps:$4 sm:$0xff]   ;;  %v2136_v51 = vld [vmem:[#allocation4 + $0x184] ss:$16 sps:$4 sm:$0xff]   ;;  %v2133_v52 = vld [vmem:[#allocation4 + $0x1e8] ss:$16 sps:$4 sm:$0xff]  }
  0x50   :  { %v2138_v53 = vld [vmem:[#allocation4 + $0x180] ss:$16 sps:$4 sm:$0xff]   ;;  %v2141_v54 = vld [vmem:[#allocation4 + $0x1cc] ss:$16 sps:$4 sm:$0xff]   ;;  %v2142_v56 = vld [vmem:[#allocation4 + $0x164] ss:$16 sps:$4 sm:$0xff]  }
  0x51   :  { %672 = vmatpush1.bf16.msra.mxu1 %v2091_v24  ;;  %v112_v55 = vld [vmem:[#allocation2 + $0x8] sm:$0xff]  ;;  %v2139_v58 = vld [vmem:[#allocation4 + $0x1c8] ss:$16 sps:$4 sm:$0xff]   ;;  %v2147_v60 = vld [vmem:[#allocation4 + $0x1ac] ss:$16 sps:$4 sm:$0xff]   ;;  %vm2434_vm3 = vmmov 0  }
  0x52   :  { %596 = vmatpush1.bf16.msra.mxu0 %v2096_v25  ;;  %673 = vmatprep.subr.bf16.mxu1 %v2099_v26  ;;  %v115_v57 = vpack.c.bf16 %v112_v55, %v112_v55  ;;  %v2144_v59 = vld [vmem:[#allocation4 + $0x160] ss:$16 sps:$4 sm:$0xff]   ;;  %v2148_v61 = vld [vmem:[#allocation4 + $0x144] ss:$16 sps:$4 sm:$0xff]   ;;  %v2145_v62 = vld [vmem:[#allocation4 + $0x1a8] ss:$16 sps:$4 sm:$0xff]  }
  0x53   :  { %597 = vmatprep.subr.bf16.mxu0 %v2100_v27  ;;  %v2150_v63 = vld [vmem:[#allocation4 + $0x140] ss:$16 sps:$4 sm:$0xff]   ;;  %v2153_v1 = vld [vmem:[#allocation4 + $0x18c] ss:$16 sps:$4 sm:$0xff]   ;;  %v2154_v2 = vld [vmem:[#allocation4 + $0x124] ss:$16 sps:$4 sm:$0xff]  }
  0x54   :  { %619 = vmatprep.mubr.bf16.mxu0 %v115_v57  ;;  %701 = vmatprep.mubr.bf16.mxu1 %v115_v57  ;;  %v2151_v3 = vld [vmem:[#allocation4 + $0x188] ss:$16 sps:$4 sm:$0xff]   ;;  %v2156_v4 = vld [vmem:[#allocation4 + $0x120] ss:$16 sps:$4 sm:$0xff]   ;;  %v2159_v6 = vld [vmem:[#allocation4 + $0x16c] ss:$16 sps:$4 sm:$0xff]  }
  0x55   :  { %674 = vmatpush1.bf16.msra.mxu1 %v2097_v28  ;;  %v2160_v7 = vld [vmem:[#allocation4 + $0x104] ss:$16 sps:$4 sm:$0xff]   ;;  %v2168_v8 = vld [vmem:[#allocation4 + $0x22c] ss:$16 sps:$4 sm:$0x3f]   ;;  %vm1755_vm4 = vcmask 64512  }
  0x56   :  { %598 = vmatpush1.bf16.msra.mxu0 %v2102_v29  ;;  %675 = vmatprep.subr.bf16.mxu1 %v2105_v30  ;;  %v2157_v9 = vld [vmem:[#allocation4 + $0x168] ss:$16 sps:$4 sm:$0xff]   ;;  %v2162_v10 = vld [vmem:[#allocation4 + $0x100] ss:$16 sps:$4 sm:$0xff]   ;;  %v2165_v13 = vld [vmem:[#allocation4 + $0x14c] ss:$16 sps:$4 sm:$0xff]   ;;  %v585_v14 = vand.u32 %v2168_v8, %v2527_v5 }
  0x57   :  { %599 = vmatprep.subr.bf16.mxu0 %v2106_v31  ;;  %v111_v11 = vld [vmem:[#allocation2] sm:$0xff]  ;;  %v2178_v25 = vld [vmem:[#allocation6 + $0x70] ss:$8 sps:$4 sm:$0xff]   ;;  %v2186_v28 = vld [vmem:[#allocation6 + $0x54] ss:$8 sps:$4 sm:$0xff]  }
  0x58   :  { %v2166_v12 = vld [vmem:[#allocation4 + $0x228] ss:$16 sps:$4 sm:$0x3f]   ;;  %v114_v16 = vpack.c.bf16 %v111_v11, %v111_v11  ;;  %v2171_v17 = vld [vmem:[#allocation4 + $0x12c] ss:$16 sps:$4 sm:$0xff]  }
  0x59   :  { %676 = vmatpush1.bf16.msra.mxu1 %v2103_v32  ;;  %v2163_v15 = vld [vmem:[#allocation4 + $0x148] ss:$16 sps:$4 sm:$0xff]   ;;  %v2174_v18 = vld [vmem:[#allocation4 + $0x20c] ss:$16 sps:$4 sm:$0xff]   ;;  %v582_v20 = vand.u32 %v2166_v12, %v2527_v5 }
  0x5a   :  { %600 = vmatpush1.bf16.msra.mxu0 %v2108_v33  ;;  %677 = vmatprep.subr.bf16.mxu1 %v2111_v34  ;;  %v2169_v21 = vld [vmem:[#allocation4 + $0x128] ss:$16 sps:$4 sm:$0xff]   ;;  %v2177_v23 = vld [vmem:[#allocation4 + $0x10c] ss:$16 sps:$4 sm:$0xff]  }
  0x5b   :  { %601 = vmatprep.subr.bf16.mxu0 %v2112_v35  ;;  %v2172_v22 = vld [vmem:[#allocation4 + $0x208] ss:$16 sps:$4 sm:$0xff]   ;;  %v2180_v5 = vld [vmem:[#allocation6 + $0x74] ss:$8 sps:$4 sm:$0xff]   ;;  %v2183_v26 = vld [vmem:[#allocation6 + $0x64] ss:$8 sps:$4 sm:$0xff]  }
  0x5c   :  { %v2175_v24 = vld [vmem:[#allocation4 + $0x108] ss:$16 sps:$4 sm:$0xff]   ;;  %v2192_v31 = vld [vmem:[#allocation6 + $0x44] ss:$8 sps:$4 sm:$0xff]   ;;  %v2201_v34 = vld [vmem:[#allocation6 + $0x154] ss:$8 sps:$4 sm:$0xff]  }
  0x5d   :  { %678 = vmatpush1.bf16.msra.mxu1 %v2109_v36  ;;  %v2181_v27 = vld [vmem:[#allocation6 + $0x60] ss:$8 sps:$4 sm:$0xff]   ;;  %v2187_v29 = vld [vmem:[#allocation6 + $0x170] ss:$8 sps:$4 sm:$0xff]   ;;  %v2195_v32 = vld [vmem:[#allocation6 + $0x164] ss:$8 sps:$4 sm:$0xff]  }
  0x5e   :  { %602 = vmatpush1.bf16.msra.mxu0 %v2114_v37  ;;  %679 = vmatprep.subr.bf16.mxu1 %v2117_v38  ;;  %v2184_v30 = vld [vmem:[#allocation6 + $0x50] ss:$8 sps:$4 sm:$0xff]   ;;  %v2190_v33 = vld [vmem:[#allocation6 + $0x40] ss:$8 sps:$4 sm:$0xff]   ;;  %v2198_v35 = vld [vmem:[#allocation6 + $0x34] ss:$8 sps:$4 sm:$0xff]  }
  0x5f   :  { %603 = vmatprep.subr.bf16.mxu0 %v2118_v39  ;;  %v2199_v36 = vld [vmem:[#allocation6 + $0x150] ss:$8 sps:$4 sm:$0xff]   ;;  %v2207_v38 = vld [vmem:[#allocation6 + $0x144] ss:$8 sps:$4 sm:$0xff]   ;;  %v2226_v57 = vld [vmem:[#allocation6 + $0xe0] ss:$8 sps:$4 sm:$0xff]  }
  0x60   :  { %v2196_v37 = vld [vmem:[#allocation6 + $0x30] ss:$8 sps:$4 sm:$0xff]   ;;  %v2204_v39 = vld [vmem:[#allocation6 + $0x24] ss:$8 sps:$4 sm:$0xff]   ;;  %v2253_v11 = vld [vmem:[#allocation6 + $0x1c0] ss:$8 sps:$4 sm:$0xff]  }
  0x61   :  { %680 = vmatpush1.bf16.msra.mxu1 %v2115_v40  ;;  %v2205_v40 = vld [vmem:[#allocation6 + $0x140] ss:$8 sps:$4 sm:$0xff]   ;;  %v2228_v55 = vld [vmem:[#allocation6 + $0xe4] ss:$8 sps:$4 sm:$0xff]   ;;  %v2258_v12 = vld [vmem:[#allocation6 + $0x94] ss:$8 sps:$4 sm:$0xff]  }
  0x62   :  { %604 = vmatpush2.bf16.msra.mxu0 %v2120_v41  ;;  %681 = vmatprep.subr.bf16.mxu1 %v2123_v42  ;;  %v2202_v41 = vld [vmem:[#allocation6 + $0x20] ss:$8 sps:$4 sm:$0xff]   ;;  %v2213_v42 = vld [vmem:[#allocation6 + $0x134] ss:$8 sps:$4 sm:$0xff]   ;;  %v2252_v8 = vld [vmem:[#allocation6 + $0xa4] ss:$8 sps:$4 sm:$0xff]  }
  0x63   :  { %605 = vmatprep.subr.bf16.mxu0 %v2124_v43  ;;  %v2210_v43 = vld [vmem:[#allocation6 + $0x14] ss:$8 sps:$4 sm:$0xff]  }
  0x65   :  { %682 = vmatpush1.bf16.msra.mxu1 %v2121_v44  ;;  %v2208_v44 = vld [vmem:[#allocation6 + $0x10] ss:$8 sps:$4 sm:$0xff]  }
  0x66   :  { %606 = vmatpush2.bf16.msra.mxu0 %v2126_v45  ;;  %683 = vmatprep.subr.bf16.mxu1 %v2129_v46  ;;  %v2211_v45 = vld [vmem:[#allocation6 + $0x130] ss:$8 sps:$4 sm:$0xff]   ;;  %v2216_v46 = vld [vmem:[#allocation6 + $0x4] ss:$8 sps:$4 sm:$0xff]  }
  0x67   :  { %607 = vmatprep.subr.bf16.mxu0 %v2130_v47  ;;  %v2219_v47 = vld [vmem:[#allocation6 + $0x124] ss:$8 sps:$4 sm:$0xff]  }
  0x69   :  { %684 = vmatpush1.bf16.msra.mxu1 %v2127_v48  ;;  %v2217_v48 = vld [vmem:[#allocation6 + $0x120] ss:$8 sps:$4 sm:$0xff]  }
  0x6a   :  { %608 = vmatpush2.bf16.msra.mxu0 %v2132_v49  ;;  %685 = vmatprep.subr.bf16.mxu1 %v2135_v50  ;;  %v2214_v49 = vld [vmem:[#allocation6] ss:$8 sps:$4 sm:$0xff]   ;;  %v2225_v50 = vld [vmem:[#allocation6 + $0x114] ss:$8 sps:$4 sm:$0xff]  }
  0x6b   :  { %609 = vmatprep.subr.bf16.mxu0 %v2136_v51  ;;  %v2222_v51 = vld [vmem:[#allocation6 + $0xf4] ss:$8 sps:$4 sm:$0xff]  }
  0x6d   :  { %686 = vmatpush2.bf16.msra.mxu1 %v2133_v52  ;;  %v2223_v52 = vld [vmem:[#allocation6 + $0x110] ss:$8 sps:$4 sm:$0xff]  }
  0x6e   :  { %610 = vmatpush2.bf16.msra.mxu0 %v2138_v53  ;;  %687 = vmatprep.subr.bf16.mxu1 %v2141_v54  ;;  %v2220_v53 = vld [vmem:[#allocation6 + $0xf0] ss:$8 sps:$4 sm:$0xff]   ;;  %v2231_v54 = vld [vmem:[#allocation6 + $0x104] ss:$8 sps:$4 sm:$0xff]  }
  0x6f   :  { %611 = vmatprep.subr.bf16.mxu0 %v2142_v56  ;;  %v2229_v56 = vld [vmem:[#allocation6 + $0x100] ss:$8 sps:$4 sm:$0xff]  }
  0x71   :  { %688 = vmatpush2.bf16.msra.mxu1 %v2139_v58  ;;  %v2237_v58 = vld [vmem:[#allocation6 + $0x1f4] ss:$8 sps:$4 sm:$0xff]  }
  0x72   :  { %612 = vmatpush2.bf16.msra.mxu0 %v2144_v59  ;;  %689 = vmatprep.subr.bf16.mxu1 %v2147_v60  ;;  %v2234_v59 = vld [vmem:[#allocation6 + $0xd4] ss:$8 sps:$4 sm:$0xff]   ;;  %v2235_v60 = vld [vmem:[#allocation6 + $0x1f0] ss:$8 sps:$4 sm:$0xff]  }
  0x73   :  { %613 = vmatprep.subr.bf16.mxu0 %v2148_v61  ;;  %v2232_v61 = vld [vmem:[#allocation6 + $0xd0] ss:$8 sps:$4 sm:$0xff]  }
  0x75   :  { %690 = vmatpush2.bf16.msra.mxu1 %v2145_v62  ;;  %v2243_v62 = vld [vmem:[#allocation6 + $0x1e4] ss:$8 sps:$4 sm:$0xff]  }
  0x76   :  { %614 = vmatpush2.bf16.msra.mxu0 %v2150_v63  ;;  %691 = vmatprep.subr.bf16.mxu1 %v2153_v1  ;;  %v2240_v63 = vld [vmem:[#allocation6 + $0xc4] ss:$8 sps:$4 sm:$0xff]   ;;  %v2241_v1 = vld [vmem:[#allocation6 + $0x1e0] ss:$8 sps:$4 sm:$0xff]  }
  0x77   :  { %615 = vmatprep.subr.bf16.mxu0 %v2154_v2  ;;  %v2238_v2 = vld [vmem:[#allocation6 + $0xc0] ss:$8 sps:$4 sm:$0xff]  }
  0x79   :  { %692 = vmatpush2.bf16.msra.mxu1 %v2151_v3  ;;  %v2249_v3 = vld [vmem:[#allocation6 + $0x1d4] ss:$8 sps:$4 sm:$0xff]  }
  0x7a   :  { %616 = vmatpush2.bf16.msra.mxu0 %v2156_v4  ;;  %693 = vmatprep.subr.bf16.mxu1 %v2159_v6  ;;  %v2246_v4 = vld [vmem:[#allocation6 + $0xb4] ss:$8 sps:$4 sm:$0xff]   ;;  %v2247_v6 = vld [vmem:[#allocation6 + $0x1d0] ss:$8 sps:$4 sm:$0xff]  }
  0x7b   :  { %617 = vmatprep.subr.bf16.mxu0 %v2160_v7  ;;  %v2244_v7 = vld [vmem:[#allocation6 + $0xb0] ss:$8 sps:$4 sm:$0xff]  }
  0x7d   :  { %694 = vmatpush2.bf16.msra.mxu1 %v2157_v9  ;;  %v2250_v9 = vld [vmem:[#allocation6 + $0xa0] ss:$8 sps:$4 sm:$0xff]  }
  0x7e   :  { %618 = vmatpush2.bf16.msra.mxu0 %v2162_v10  ;;  %695 = vmatprep.subr.bf16.mxu1 %v2165_v13  ;;  %v2255_v10 = vld [vmem:[#allocation6 + $0x1c4] ss:$8 sps:$4 sm:$0xff]   ;;  %v2256_v13 = vld [vmem:[#allocation6 + $0x90] ss:$8 sps:$4 sm:$0xff]  }
  0x7f   :  { %722 = vmatprep.subr.bf16.mxu0 %v585_v14  ;;  %v2261_v14 = vld [vmem:[#allocation6 + $0x1b4] ss:$8 sps:$4 sm:$0xff]  }
  0x81   :  { %620 = vmatmul.mubr.bf16.vlgmr.msra.gmra.mxu0 %v114_v16  ;;  %696 = vmatpush2.bf16.msra.mxu1 %v2163_v15  ;;  %v2259_v15 = vld [vmem:[#allocation6 + $0x1b0] ss:$8 sps:$4 sm:$0xff]  }
  0x82   :  { %723 = vmatpush1.bf16.msra.mxu0 %v582_v20  ;;  %697 = vmatprep.subr.bf16.mxu1 %v2171_v17  ;;  %v2262_v17 = vld [vmem:[#allocation6 + $0x80] ss:$8 sps:$4 sm:$0xff]  }
  0x83   :  { %724 = vmatprep.subr.bf16.mxu0 %v2174_v18  ;;  %742 = vmatprep.mubr.bf16.mxu0 %v2431_v0  ;;  %v2189_v0 = vld [vmem:[#allocation6 + $0x174] ss:$8 sps:$4 sm:$0xff]   ;;  %v2267_v18 = vld [vmem:[#allocation6 + $0x1a4] ss:$8 sps:$4 sm:$0xff]   ;;  %v2265_v20 = vld [vmem:[#allocation6 + $0x1a0] ss:$8 sps:$4 sm:$0xff]  }
  0x85   :  { %698 = vmatpush2.bf16.msra.mxu1 %v2169_v21  ;;  %v2270_v21 = vld [vmem:[#allocation6 + $0x194] ss:$8 sps:$4 sm:$0xff]  }
  0x86   :  { %725 = vmatpush1.bf16.msra.mxu0 %v2172_v22  ;;  %699 = vmatprep.subr.bf16.mxu1 %v2177_v23  ;;  %v2268_v22 = vld [vmem:[#allocation6 + $0x190] ss:$8 sps:$4 sm:$0xff]   ;;  %v2273_v23 = vld [vmem:[#allocation6 + $0x184] ss:$8 sps:$4 sm:$0xff]  }
  0x87   :  { %1155 = vmatprep.subr.bf16.mxu0 %v2180_v5  ;;  %v2274_v5 = vld [vmem:[#allocation7 + $0x78] sm:$0xff]  }
  0x89   :  { %1837 = vmatmul.mubr.msk.bf16.vlgmr.msra.gmra.mxu0 %vm567_vm2, %v2531_v19  ;;  %700 = vmatpush2.bf16.msra.mxu1 %v2175_v24  ;;  %v2193_v19 = vld [vmem:[#allocation6 + $0x160] ss:$8 sps:$4 sm:$0xff]  }
  0x8a   :  { %1156 = vmatpush1.bf16.msra.mxu0 %v2178_v25  ;;  %1196 = vmatprep.subr.bf16.mxu1 %v2189_v0  ;;  %v2271_v24 = vld [vmem:[#allocation6 + $0x180] ss:$8 sps:$4 sm:$0xff]  }
  0x8b   :  { %1157 = vmatprep.subr.bf16.mxu0 %v2183_v26 }
  0x8c   :  { %702 = vmatmul.mubr.bf16.vlgmr.msra.gmra.mxu1 %v114_v16  ;;  %v2264_v16 = vld [vmem:[#allocation6 + $0x84] ss:$8 sps:$4 sm:$0xff]  }
  0x8d   :  { %1197 = vmatpush1.bf16.msra.mxu1 %v2187_v29  ;;  %v191_v29 = vlaneseq }
  0x8e   :  { %1158 = vmatpush1.bf16.msra.mxu0 %v2181_v27  ;;  %1198 = vmatprep.subr.bf16.mxu1 %v2195_v32 }
  0x8f   :  { %1159 = vmatprep.subr.bf16.mxu0 %v2186_v28 }
  0x91   :  { %1199 = vmatpush1.bf16.msra.mxu1 %v2193_v19 }
  0x92   :  { %1160 = vmatpush1.bf16.msra.mxu0 %v2184_v30  ;;  %1200 = vmatprep.subr.bf16.mxu1 %v2201_v34  ;;  %v2540_v30 = vshrl.u32 %v191_v29, 7 }
  0x93   :  { %1161 = vmatprep.subr.bf16.mxu0 %v2192_v31  ;;  %v189_v31 = vld [vmem:[%s2655_s2] sm:$0xf] }
  0x94   :  { %v193_v0 = vsub.s32 0, %v2540_v30  ;;  %v197_v32 = vsub.s32 1, %v2540_v30 }
  0x95   :  { %1201 = vmatpush1.bf16.msra.mxu1 %v2199_v36 }
  0x96   :  { %1162 = vmatpush1.bf16.msra.mxu0 %v2190_v33  ;;  %1202 = vmatprep.subr.bf16.mxu1 %v2207_v38  ;;  %v194_v19 = vrot.slane %v189_v31, %v193_v0  ;;  %v198_v33 = vrot.slane %v189_v31, %v197_v32 }
  0x97   :  { %1163 = vmatprep.subr.bf16.mxu0 %v2198_v35 }
  0x99   :  { %1203 = vmatpush1.bf16.msra.mxu1 %v2205_v40 }
  0x9a   :  { %1164 = vmatpush1.bf16.msra.mxu0 %v2196_v37  ;;  %1204 = vmatprep.subr.bf16.mxu1 %v2213_v42 }
  0x9b   :  { %1165 = vmatprep.subr.bf16.mxu0 %v2204_v39 }
  0x9d   :  { %1205 = vmatpush1.bf16.msra.mxu1 %v2211_v45  ;;  %v205_v45 = vsub.s32 3, %v2540_v30 }
  0x9e   :  { %1166 = vmatpush1.bf16.msra.mxu0 %v2202_v41  ;;  %1206 = vmatprep.subr.bf16.mxu1 %v2219_v47  ;;  %v201_v41 = vsub.s32 2, %v2540_v30  ;;  %v2296_v30 = vld [vmem:[%s2660_s7 + $0x8] sm:$0xff]  }
  0x9f   :  { %1167 = vmatprep.subr.bf16.mxu0 %v2210_v43 }
  0xa1   :  { %1207 = vmatpush1.bf16.msra.mxu1 %v2217_v48  ;;  %v202_v48 = vrot.slane %v189_v31, %v201_v41 }
  0xa2   :  { %1168 = vmatpush1.bf16.msra.mxu0 %v2208_v44  ;;  %1208 = vmatprep.subr.bf16.mxu1 %v2225_v50 }
  0xa3   :  { %1169 = vmatprep.subr.bf16.mxu0 %v2216_v46 }
  0xa5   :  { %1209 = vmatpush1.bf16.msra.mxu1 %v2223_v52  ;;  %v2276_v52 = vld [vmem:[#allocation7 + $0x70] sm:$0xff]  }
  0xa6   :  { %1170 = vmatpush1.bf16.msra.mxu0 %v2214_v49  ;;  %1210 = vmatprep.subr.bf16.mxu1 %v2231_v54  ;;  %v2275_v49 = vld [vmem:[#allocation7 + $0x38] sm:$0xff]  }
  0xa7   :  { %1171 = vmatprep.subr.bf16.mxu0 %v2222_v51 }
  0xa9   :  { %1211 = vmatpush1.bf16.msra.mxu1 %v2229_v56 }
  0xaa   :  { %1172 = vmatpush2.bf16.msra.mxu0 %v2220_v53  ;;  %1212 = vmatprep.subr.bf16.mxu1 %v2237_v58  ;;  %v206_v53 = vrot.slane %v189_v31, %v205_v45  ;;  %v2298_v45 = vld [vmem:[#allocation9 + $0x38] sm:$0xff]  }
  0xab   :  { %1173 = vmatprep.subr.bf16.mxu0 %v2228_v55 }
  0xad   :  { %1213 = vmatpush2.bf16.msra.mxu1 %v2235_v60  ;;  %v2278_v60 = vld [vmem:[#allocation7 + $0x68] sm:$0xff]  }
  0xae   :  { %1174 = vmatpush2.bf16.msra.mxu0 %v2226_v57  ;;  %1214 = vmatprep.subr.bf16.mxu1 %v2243_v62  ;;  %v2277_v57 = vld [vmem:[#allocation7 + $0x30] sm:$0xff]  }
  0xaf   :  { %1175 = vmatprep.subr.bf16.mxu0 %v2234_v59 }
  0xb1   :  { %1215 = vmatpush2.bf16.msra.mxu1 %v2241_v1 }
  0xb2   :  { %1176 = vmatpush2.bf16.msra.mxu0 %v2232_v61  ;;  %1216 = vmatprep.subr.bf16.mxu1 %v2249_v3 }
  0xb3   :  { %1177 = vmatprep.subr.bf16.mxu0 %v2240_v63 }
  0xb5   :  { %1217 = vmatpush2.bf16.msra.mxu1 %v2247_v6 }
  0xb6   :  { %1178 = vmatpush2.bf16.msra.mxu0 %v2238_v2  ;;  %1218 = vmatprep.subr.bf16.mxu1 %v2255_v10  ;;  %v2279_v2 = vld [vmem:[#allocation7 + $0x28] sm:$0xff]   ;;  %v2281_v10 = vld [vmem:[#allocation7 + $0x20] sm:$0xff]  }
  0xb7   :  { %1179 = vmatprep.subr.bf16.mxu0 %v2246_v4 }
  0xb9   :  { %1219 = vmatpush2.bf16.msra.mxu1 %v2253_v11  ;;  %v2282_v11 = vld [vmem:[#allocation7 + $0x58] sm:$0xff]  }
  0xba   :  { %1180 = vmatpush2.bf16.msra.mxu0 %v2244_v7  ;;  %1220 = vmatprep.subr.bf16.mxu1 %v2261_v14  ;;  %v2285_v14 = vld [vmem:[#allocation7 + $0x10] sm:$0xff]  }
  0xbb   :  { %1181 = vmatprep.subr.bf16.mxu0 %v2252_v8 }
  0xbd   :  { %1221 = vmatpush2.bf16.msra.mxu1 %v2259_v15  ;;  %v2286_v15 = vld [vmem:[#allocation7 + $0x48] sm:$0xff]  }
  0xbe   :  { %1182 = vmatpush2.bf16.msra.mxu0 %v2250_v9  ;;  %1222 = vmatprep.subr.bf16.mxu1 %v2267_v18  ;;  %v2280_v9 = vld [vmem:[#allocation7 + $0x60] sm:$0xff]  }
  0xbf   :  { %1183 = vmatprep.subr.bf16.mxu0 %v2258_v12  ;;  %v2283_v12 = vld [vmem:[#allocation7 + $0x18] sm:$0xff]   ;;  %v2289_v18 = vld [vmem:[#allocation7] sm:$0xff]  }
  0xc1   :  { %1223 = vmatpush2.bf16.msra.mxu1 %v2265_v20  ;;  %v2290_v20 = vld [vmem:[%s2660_s7 + $0x38] sm:$0xff]  }
  0xc2   :  { %1184 = vmatpush2.bf16.msra.mxu0 %v2256_v13  ;;  %1224 = vmatprep.subr.bf16.mxu1 %v2270_v21  ;;  %v2284_v13 = vld [vmem:[#allocation7 + $0x50] sm:$0xff]   ;;  %v2433_v21 = vmov 0.0  }
  0xc3   :  { %1185 = vmatprep.subr.bf16.mxu0 %v2264_v16  ;;  %v2287_v16 = vld [vmem:[#allocation7 + $0x8] sm:$0xff]  }
  0xc5   :  { %1225 = vmatpush2.bf16.msra.mxu1 %v2268_v22  ;;  %v2291_v22 = vld [vmem:[%s2660_s7 + $0x30] sm:$0xff]  }
  0xc6   :  { %1186 = vmatpush2.bf16.msra.mxu0 %v2262_v17  ;;  %1226 = vmatprep.subr.bf16.mxu1 %v2273_v23  ;;  %v2288_v17 = vld [vmem:[#allocation7 + $0x40] sm:$0xff]   ;;  %v2292_v23 = vld [vmem:[%s2660_s7 + $0x28] sm:$0xff]  }
  0xc7   :  { %1946 = vmatprep.subr.bf16.mxu0 %v2274_v5  ;;  %v2294_v5 = vld [vmem:[%s2660_s7 + $0x18] sm:$0xff]  }
  0xc9   :  { %1227 = vmatpush2.bf16.msra.mxu1 %v2271_v24  ;;  %v2293_v24 = vld [vmem:[%s2660_s7 + $0x20] sm:$0xff]  }
  0xca   :  { %1995 = vmatprep.subr.bf16.mxu1 %v2433_v21 }
 0x10c   :  { %v662_v25 = vpop.f32.mrf.mxu1 }
 0x10e   :  { %v664_v26 = vpop.f32.mrf.mxu1 }
 0x110   :  { %v666_v27 = vpop.f32.mrf.mxu1 }
 0x111   :  { %v823_v27 = vld [vmem:[%s2657_s4] sm:$0x3] }
 0x112   :  { %v667_v28 = vpop.f32.mrf.mxu1  ;;  %v828_v31 = vrot.slane %v823_v27, %v193_v0  ;;  %v2295_v0 = vld [vmem:[%s2660_s7 + $0x10] sm:$0xff]  }
 0x141   :  { %v621_v34 = vpop.f32.mrf.mxu0 }
 0x142   :  { %v622_v35 = vadd.f32 %v621_v34, %v194_v19  ;;  %v832_v19 = vrot.slane %v823_v27, %v197_v32  ;;  %v2297_v32 = vld [vmem:[%s2660_s7] sm:$0xff]  }
 0x143   :  { %v623_v36 = vpop.f32.mrf.mxu0 }
 0x144   :  { %v663_v37 = vadd.f32 %v662_v25, %v622_v35  ;;  %v624_v38 = vadd.f32 %v623_v36, %v198_v33 }
 0x145   :  { %v625_v39 = vpop.f32.mrf.mxu0 }
 0x146   :  { %v665_v40 = vadd.f32 %v664_v26, %v624_v38  ;;  %v751_v42 = vmax.f32 %v663_v37, 0.0 }
 0x147   :  { %v626_v43 = vpop.f32.mrf.mxu0 }
 0x148   :  { %v752_v44 = vmax.f32 %v665_v40, 0.0  ;;  %v755_v50 = vpack.c.bf16 %v751_v42, %v751_v42 }
 0x149   :  { %v744_v46 = vpop.f32.mrf.mxu0 }
 0x14a   :  { %v756_v47 = vpack.c.bf16 %v752_v44, %v752_v44 }
 0x14b   :  { %v746_v51 = vpop.f32.mrf.mxu0 }
 0x14c   :  { %1187 = vmatprep.mubr.bf16.mxu0 %v756_v47  ;;  %v703_v54 = vpop.f32.mrf.mxu1  ;;  %v2300_v47 = vld [vmem:[#allocation9 + $0x28] sm:$0xff]  }
 0x14d   :  { %v748_v55 = vpop.f32.mrf.mxu0  ;;  %1188 = vmatmul.mubr.bf16.vlgmr.msra.gmra.mxu0 %v755_v50  ;;  %v704_v56 = vadd.f32 %v703_v54, %v202_v48  ;;  %v2301_v48 = vld [vmem:[#allocation9 + $0x20] sm:$0xff]   ;;  %v2303_v50 = vld [vmem:[#allocation9 + $0x10] sm:$0xff]  }
 0x14e   :  { %1947 = vmatpush3.bf16.msra.mxu0 %v2275_v49  ;;  %v705_v58 = vpop.f32.mrf.mxu1  ;;  %v2302_v49 = vld [vmem:[#allocation9 + $0x18] sm:$0xff]  }
 0x14f   :  { %v749_v59 = vpop.f32.mrf.mxu0  ;;  %1948 = vmatprep.subr.bf16.mxu0 %v2276_v52  ;;  %v745_v61 = vadd.f32 %v744_v46, %v704_v56  ;;  %v706_v62 = vadd.f32 %v705_v58, %v206_v53  ;;  %v2299_v46 = vld [vmem:[#allocation9 + $0x30] sm:$0xff]   ;;  %v1902_v52 = vld [vmem:[%s2659_s6] ss:$0 sm:$0xff] }
 0x150   :  { %v707_v63 = vpop.f32.mrf.mxu1 }
 0x151   :  { %v747_v1 = vadd.f32 %v746_v51, %v706_v62  ;;  %v753_v3 = vmax.f32 %v745_v61, 0.0  ;;  %v2305_v61 = vld [vmem:[#allocation9] sm:$0xff]   ;;  %v2307_v63 = vld [vmem:[%s2664_s11 + $0x30] sm:$0xff]  }
 0x152   :  { %1949 = vmatpush3.bf16.msra.mxu0 %v2277_v57  ;;  %v708_v4 = vpop.f32.mrf.mxu1  ;;  %v2306_v62 = vld [vmem:[%s2664_s11 + $0x38] sm:$0xff]  }
 0x153   :  { %1950 = vmatprep.subr.bf16.mxu0 %v2278_v60  ;;  %v754_v6 = vmax.f32 %v747_v1, 0.0  ;;  %v757_v8 = vpack.c.bf16 %v753_v3, %v753_v3  ;;  %v2304_v60 = vld [vmem:[#allocation9 + $0x8] sm:$0xff]   ;;  %v2308_v1 = vld [vmem:[%s2664_s11 + $0x28] sm:$0xff]   ;;  %v2310_v3 = vld [vmem:[%s2664_s11 + $0x18] sm:$0xff]  }
 0x154   :  { %v2311_v4 = vld [vmem:[%s2664_s11 + $0x10] sm:$0xff]  }
 0x155   :  { %v758_v7 = vpack.c.bf16 %v754_v6, %v754_v6  ;;  %v1919_v6 = vld [vmem:[%s2661_s8] ss:$0 sm:$0xff] }
 0x156   :  { %1951 = vmatpush3.bf16.msra.mxu0 %v2279_v2  ;;  %v2309_v2 = vld [vmem:[%s2664_s11 + $0x20] sm:$0xff]  }
 0x157   :  { %1228 = vmatprep.mubr.bf16.mxu1 %v758_v7  ;;  %1952 = vmatprep.subr.bf16.mxu0 %v2280_v9 }
 0x158   :  { %1229 = vmatmul.mubr.bf16.vlgmr.msra.gmra.mxu1 %v757_v8 }
 0x159   :  { %1996 = vmatpush3.bf16.msra.mxu1 %v2290_v20  ;;  %2011 = vmatprep.mubr.msk.bf16.mxu1 %vm2434_vm3, %v2433_v21 }
 0x15a   :  { %1953 = vmatpush3.bf16.msra.mxu0 %v2281_v10  ;;  %1997 = vmatprep.subr.bf16.mxu1 %v2433_v21 }
 0x15b   :  { %1954 = vmatprep.subr.bf16.mxu0 %v2282_v11 }
 0x15d   :  { %1998 = vmatpush3.bf16.msra.mxu1 %v2291_v22 }
 0x15e   :  { %1955 = vmatpush3.bf16.msra.mxu0 %v2283_v12  ;;  %1999 = vmatprep.subr.bf16.mxu1 %v2433_v21 }
 0x15f   :  { %1956 = vmatprep.subr.bf16.mxu0 %v2284_v13 }
 0x161   :  { %2000 = vmatpush3.bf16.msra.mxu1 %v2292_v23 }
 0x162   :  { %1957 = vmatpush3.bf16.msra.mxu0 %v2285_v14  ;;  %2001 = vmatprep.subr.bf16.mxu1 %v2433_v21  ;;  %v2312_v14 = vld [vmem:[%s2664_s11 + $0x8] sm:$0xff]  }
 0x163   :  { %1958 = vmatprep.subr.bf16.mxu0 %v2286_v15  ;;  %v2313_v15 = vld [vmem:[%s2664_s11] sm:$0xff]  }
 0x165   :  { %2002 = vmatpush3.bf16.msra.mxu1 %v2293_v24 }
 0x166   :  { %1959 = vmatpush3.bf16.msra.mxu0 %v2287_v16  ;;  %2003 = vmatprep.subr.bf16.mxu1 %v2433_v21  ;;  %v1928_v16 = vld [vmem:[%s2663_s10] ss:$0 sm:$0xff] }
 0x167   :  { %1960 = vmatprep.subr.bf16.mxu0 %v2288_v17 }
 0x169   :  { %2004 = vmatpush3.bf16.msra.mxu1 %v2294_v5 }
 0x16a   :  { %1961 = vmatpush3.bf16.msra.mxu0 %v2289_v18  ;;  %2005 = vmatprep.subr.bf16.mxu1 %v2433_v21 }
 0x16b   :  { %2015 = vmatprep.subr.bf16.mxu0 %v2433_v21 }
 0x16d   :  { %2006 = vmatpush3.bf16.msra.mxu1 %v2295_v0 }
 0x16e   :  { %2007 = vmatprep.subr.bf16.mxu1 %v2433_v21 }
 0x171   :  { %2008 = vmatpush3.bf16.msra.mxu1 %v2296_v30 }
 0x172   :  { %2009 = vmatprep.subr.bf16.mxu1 %v2433_v21 }
 0x175   :  { %2010 = vmatpush3.bf16.msra.mxu1 %v2297_v32 }
 0x176   :  { %2035 = vmatprep.subr.bf16.mxu1 %v2433_v21 }
 0x20d   :  { %v1189_v25 = vpop.f32.mrf.mxu0 }
 0x20e   :  { %v1190_v33 = vadd.f32 %v1189_v25, %v828_v31 }
 0x20f   :  { %v1191_v26 = vpop.f32.mrf.mxu0 }
 0x210   :  { %v1192_v35 = vadd.f32 %v1191_v26, %v832_v19 }
 0x211   :  { %v1193_v28 = vpop.f32.mrf.mxu0 }
 0x213   :  { %v1194_v29 = vpop.f32.mrf.mxu0 }
 0x218   :  { %v1230_v34 = vpop.f32.mrf.mxu1 }
 0x219   :  { %v1231_v36 = vadd.f32 %v1230_v34, %v1190_v33 }
 0x21a   :  { %v1232_v37 = vpop.f32.mrf.mxu1 }
 0x21b   :  { %v1233_v38 = vadd.f32 %v1232_v37, %v1192_v35  ;;  %v1237_v39 = vmax.f32 %v1231_v36, 0.0 }
 0x21c   :  { %v1234_v40 = vpop.f32.mrf.mxu1 }
 0x21d   :  { %v1238_v41 = vmax.f32 %v1233_v38, 0.0  ;;  %v1239_v44 = vpack.c.bf16 %v1237_v39, %v1237_v39 }
 0x21e   :  { %v1235_v42 = vpop.f32.mrf.mxu1 }
 0x21f   :  { %v1240_v43 = vpack.c.bf16 %v1238_v41, %v1238_v41 }
 0x221   :  { %1408 = vmatprep.mubr.bf16.mxu0 %v1240_v43 }
 0x222   :  { %1409 = vmatmul.mubr.bf16.vlgmr.msra.gmra.mxu0 %v1239_v44 }
 0x223   :  { %2031 = vmatprep.mubr.msk.bf16.mxu0 %vm2434_vm3, %v2433_v21  ;;  %2016 = vmatpush3.bf16.msra.mxu0 %v2298_v45 }
 0x224   :  { %2017 = vmatprep.subr.bf16.mxu0 %v2433_v21 }
 0x227   :  { %2018 = vmatpush3.bf16.msra.mxu0 %v2299_v46 }
 0x228   :  { %2019 = vmatprep.subr.bf16.mxu0 %v2433_v21 }
 0x22b   :  { %2020 = vmatpush3.bf16.msra.mxu0 %v2300_v47 }
 0x22c   :  { %2021 = vmatprep.subr.bf16.mxu0 %v2433_v21 }
 0x22f   :  { %2022 = vmatpush3.bf16.msra.mxu0 %v2301_v48 }
 0x230   :  { %2023 = vmatprep.subr.bf16.mxu0 %v2433_v21 }
 0x233   :  { %2024 = vmatpush3.bf16.msra.mxu0 %v2302_v49 }
 0x234   :  { %2025 = vmatprep.subr.bf16.mxu0 %v2433_v21 }
 0x237   :  { %2026 = vmatpush3.bf16.msra.mxu0 %v2303_v50 }
 0x238   :  { %2027 = vmatprep.subr.bf16.mxu0 %v2433_v21 }
 0x23b   :  { %2028 = vmatpush3.bf16.msra.mxu0 %v2304_v60 }
 0x23c   :  { %2029 = vmatprep.subr.bf16.mxu0 %v2433_v21 }
 0x23f   :  { %2030 = vmatpush3.bf16.msra.mxu0 %v2305_v61 }
 0x2e2   :  { %v1962_v51 = vpop.f32.mrf.mxu0 }
 0x2e4   :  { %v1963_v53 = vpop.f32.mrf.mxu0 }
 0x2e5   :  { %v1964_v54 = vadd.f32 %v1963_v53, %v1962_v51 }
 0x2e6   :  { %v1965_v55 = vpop.f32.mrf.mxu0 }
 0x2e7   :  { %v1411_v56 = vadd.f32 %v1964_v54, %v1902_v52 }
 0x2e8   :  { %v1966_v57 = vpop.f32.mrf.mxu0 }
 0x2e9   :  { %v1416_v58 = vmax.f32 %v1411_v56, 0.0 }
 0x2eb   :  { %v1417_v59 = vpack.c.bf16 %v1416_v58, %v1416_v58 }
 0x2ed   :  { %2012 = vmatmul.mubr.bf16.vlgmr.msra.gmra.mxu1 %v1417_v59 }
 0x2ee   :  { %2051 = vmatprep.mubr.msk.bf16.mxu1 %vm2434_vm3, %v2433_v21  ;;  %2036 = vmatpush3.bf16.msra.mxu1 %v2306_v62 }
 0x2ef   :  { %2037 = vmatprep.subr.bf16.mxu1 %v2433_v21 }
 0x2f2   :  { %2038 = vmatpush3.bf16.msra.mxu1 %v2307_v63 }
 0x2f3   :  { %2039 = vmatprep.subr.bf16.mxu1 %v2433_v21 }
 0x2f6   :  { %2040 = vmatpush3.bf16.msra.mxu1 %v2308_v1 }
 0x2f7   :  { %2041 = vmatprep.subr.bf16.mxu1 %v2433_v21 }
 0x2fa   :  { %2042 = vmatpush3.bf16.msra.mxu1 %v2309_v2 }
 0x2fb   :  { %2043 = vmatprep.subr.bf16.mxu1 %v2433_v21 }
 0x2fe   :  { %2044 = vmatpush3.bf16.msra.mxu1 %v2310_v3 }
 0x2ff   :  { %2045 = vmatprep.subr.bf16.mxu1 %v2433_v21 }
 0x302   :  { %2046 = vmatpush3.bf16.msra.mxu1 %v2311_v4 }
 0x303   :  { %2047 = vmatprep.subr.bf16.mxu1 %v2433_v21 }
 0x306   :  { %2048 = vmatpush3.bf16.msra.mxu1 %v2312_v14 }
 0x307   :  { %2049 = vmatprep.subr.bf16.mxu1 %v2433_v21  ;;  %v1937_v21 = vld [vmem:[%s2665_s12] ss:$0 sm:$0xff] }
 0x30a   :  { %2050 = vmatpush3.bf16.msra.mxu1 %v2313_v15 }
 0x3ad   :  { %v1523_v7 = vpop.f32.mrf.mxu1 }
 0x3ae   :  { %v1524_v8 = vadd.f32 %v1919_v6, %v1523_v7 }
 0x3af   :  { %v2013_v9 = vpop.f32.mrf.mxu1 }
 0x3b0   :  { %v1529_v10 = vmax.f32 %v1524_v8, 0.0 }
 0x3b1   :  { %v1526_v11 = vpop.f32.mrf.mxu1 }
 0x3b2   :  { %v1530_v12 = vpack.c.bf16 %v1529_v10, %v1529_v10 }
 0x3b3   :  { %v2014_v13 = vpop.f32.mrf.mxu1 }
 0x3b4   :  { %2032 = vmatmul.mubr.bf16.vlgmr.msra.gmra.mxu0 %v1530_v12 }
 0x474   :  { %v1636_v17 = vpop.f32.mrf.mxu0 }
 0x475   :  { %v1637_v18 = vadd.f32 %v1928_v16, %v1636_v17 }
 0x476   :  { %v2033_v20 = vpop.f32.mrf.mxu0 }
 0x477   :  { %v1642_v22 = vmax.f32 %v1637_v18, 0.0 }
 0x478   :  { %v1639_v23 = vpop.f32.mrf.mxu0 }
 0x479   :  { %v1643_v24 = vpack.c.bf16 %v1642_v22, %v1642_v22 }
 0x47a   :  { %v2034_v5 = vpop.f32.mrf.mxu0 }
 0x47b   :  { %2052 = vmatmul.mubr.bf16.vlgmr.msra.gmra.mxu1 %v1643_v24 }
 0x53b   :  { %v1749_v25 = vpop.f32.mrf.mxu1 }
 0x53c   :  { %v1750_v26 = vadd.f32 %v1937_v21, %v1749_v25 }
 0x53d   :  { %v2053_v27 = vpop.f32.mrf.mxu1 }
 0x53e   :  { %1756 = vst.msk [vmem:[%s2666_s13] sm:$0xff] %vm1755_vm4, %v1750_v26 }
 0x53f   :  { %v1752_v28 = vpop.f32.mrf.mxu1 }
 0x541   :  { %v2054_v29 = vpop.f32.mrf.mxu1 }
 0x542   :  { %1761 = vsyncpa [#allocation3], 1 }
 0x543   :  { %1762 = vsyncpa [#allocation5], 1 }
 0x544   :  { %1763 = vsyncpa [#allocation8], 1 }

</bundles_post_ra>
